<compile_context>
chip_gen: v7x
topology: tpu7x:2x2x1
jax: 0.10.0
libtpu: 0.0.40
codegen_flags: <defaults>
</compile_context>

<pallas_src>
import jax
import jax.numpy as jnp
from jax.experimental import pallas as pl
from jax.experimental.pallas import tpu as pltpu


def _round_up(n, m):
    return ((n + m - 1) // m) * m


def _make_kernel(h1p, h2p, outp):
    """Fused (Linear -> ReLU) x2 -> Linear on lane-padded hidden widths.

    Handles both output layouts: o_ref may be lane-padded (width outp) or narrow
    (width out_size); the slice below is static either way.
    """

    def kernel(x_ref, w1_ref, w2_ref, w3_ref, b_ref, o_ref):
        wdt = w1_ref.dtype
        x = x_ref[...].astype(wdt)

        # Packed biases live at lane-aligned (128-multiple) static offsets -> free slices.
        b1 = b_ref[:, :h1p]
        b2 = b_ref[:, h1p:h1p + h2p]
        b3 = b_ref[:, h1p + h2p:h1p + h2p + outp]

        h1 = jnp.dot(x, w1_ref[...], preferred_element_type=jnp.float32) + b1
        h1 = jnp.maximum(h1, 0.0).astype(wdt)

        h2 = jnp.dot(h1, w2_ref[...], preferred_element_type=jnp.float32) + b2
        h2 = jnp.maximum(h2, 0.0).astype(wdt)

        out = jnp.dot(h2, w3_ref[...], preferred_element_type=jnp.float32) + b3
        ocols = o_ref.shape[1]                       # static
        o_ref[...] = out[:, :ocols].astype(o_ref.dtype)

    return kernel


def self_driving_network(x, padded_params):
    """Forward pass of SelfDrivingNetwork as a single fused, batch-tiled Pallas kernel.

    x: (B, input_size), f32 or bf16 (bf16 recommended for large B).
    padded_params: output of pad_params() -- weights (in, out_padded), packed bias, out_size.
    Returns (B, output_size) float32.
    """
    w1, w2, w3, b = (padded_params["w1"], padded_params["w2"],
                     padded_params["w3"], padded_params["b"])
    out_size = padded_params["out_size"]

    B, in_size = x.shape
    h1p = w1.shape[1]
    h2p = w2.shape[1]
    outp = w3.shape[1]

    # --- batch tiling -------------------------------------------------------
    # Tiny batches: one step (pure latency, nothing to shard).
    # Otherwise: at least 2 grid steps so the "parallel" axis shards across both
    # TensorCores on v7x; tile cap 1024 rows (<~3 MiB/step with double-buffering).
    if B <= 64:
        TB = B
    else:
        TB = min(1024, _round_up(-(-B // 2), 16))
    grid = (pl.cdiv(B, TB),)

    # --- output layout ------------------------------------------------------
    # Large B is HBM-bound: write the narrow (TB, out_size) block directly (masked
    # vst, but ~32x less writeback and no extra slice pass).  Tiny B keeps the
    # lane-padded unmasked-vst store and slices in the wrapper.
    narrow_out = B > 256
    out_cols = out_size if narrow_out else outp

    flops = 2 * B * (in_size * h1p + h1p * h2p + h2p * outp)
    bytes_accessed = (
        x.size * x.dtype.itemsize
        + w1.size * w1.dtype.itemsize
        + w2.size * w2.dtype.itemsize
        + w3.size * w3.dtype.itemsize
        + b.size * b.dtype.itemsize
        + B * out_cols * 4
    )

    out = pl.pallas_call(
        _make_kernel(h1p, h2p, outp),
        out_shape=jax.ShapeDtypeStruct((B, out_cols), jnp.float32),
        grid=grid,
        in_specs=[
            pl.BlockSpec((TB, in_size), lambda i: (i, 0)),          # x: tiled over batch
            pl.BlockSpec((in_size, h1p), lambda i: (0, 0)),         # weights: VMEM-resident
            pl.BlockSpec((h1p, h2p), lambda i: (0, 0)),
            pl.BlockSpec((h2p, outp), lambda i: (0, 0)),
            pl.BlockSpec((1, h1p + h2p + outp), lambda i: (0, 0)),  # packed biases (f32)
        ],
        out_specs=pl.BlockSpec((TB, out_cols), lambda i: (i, 0)),
        compiler_params=pltpu.CompilerParams(
            dimension_semantics=("parallel",),
        ),
        cost_estimate=pl.CostEstimate(
            flops=flops, transcendentals=0, bytes_accessed=bytes_accessed),
    )(x, w1, w2, w3, b)

    if narrow_out:
        return out
    return out[:, :out_size]


def pad_params(params, dtype=jnp.bfloat16, lane=128):
    """Zero-pad hidden/output widths to multiples of 128 lanes, pack biases into one
    lane-aligned f32 array, and store weights in `dtype` (default bf16 for the bf16 MXU).
    Zero-padded columns/rows contribute exactly zero, so the math is unchanged."""
    w1, b1 = params["w1"], params["b1"]
    w2, b2 = params["w2"], params["b2"]
    w3, b3 = params["w3"], params["b3"]

    in_size, h1 = w1.shape
    h2 = w2.shape[1]
    out = w3.shape[1]
    h1p, h2p, outp = _round_up(h1, lane), _round_up(h2, lane), _round_up(out, lane)

    def pad2(a, rows, cols):
        return jnp.pad(a, ((0, rows - a.shape[0]), (0, cols - a.shape[1])))

    w1p = pad2(w1, in_size, h1p).astype(dtype)
    w2p = pad2(w2, h1p, h2p).astype(dtype)
    w3p = pad2(w3, h2p, outp).astype(dtype)
    # Biases kept in f32 (they add into the f32 accumulator) and packed into one array.
    b_packed = jnp.concatenate(
        [pad2(b1, 1, h1p), pad2(b2, 1, h2p), pad2(b3, 1, outp)], axis=1
    ).astype(jnp.float32)

    return {"w1": w1p, "w2": w2p, "w3": w3p, "b": b_packed, "out_size": out}


def init_params(key, input_size, hidden1_size, hidden2_size, output_size):
    """Deterministic synthetic init matching nn.Linear's parameter shapes
    (kaiming-uniform-ish bounds), stored as (in, out) for the kernel."""
    def linear(k, fan_in, fan_out):
        kw, kb = jax.random.split(k)
        bound = 1.0 / jnp.sqrt(jnp.float32(fan_in))
        w = jax.random.uniform(kw, (fan_in, fan_out), jnp.float32, -bound, bound)
        b = jax.random.uniform(kb, (1, fan_out), jnp.float32, -bound, bound)
        return w, b

    k1, k2, k3 = jax.random.split(key, 3)
    w1, b1 = linear(k1, input_size, hidden1_size)
    w2, b2 = linear(k2, hidden1_size, hidden2_size)
    w3, b3 = linear(k3, hidden2_size, output_size)
    return {"w1": w1, "b1": b1, "w2": w2, "b2": b2, "w3": w3, "b3": b3}


def _reference(x, p):
    h1 = jnp.maximum(x @ p["w1"] + p["b1"], 0.0)
    h2 = jnp.maximum(h1 @ p["w2"] + p["b2"], 0.0)
    return h2 @ p["w3"] + p["b3"]


if __name__ == "__main__":
    # Small shapes implied by the module: a batch of feature vectors.
    batch, input_size, hidden1, hidden2, output_size = 8, 16, 32, 32, 4

    key = jax.random.PRNGKey(0)
    kx, kp, kxl = jax.random.split(key, 3)
    x = jax.random.normal(kx, (batch, input_size), jnp.float32)
    params = init_params(kp, input_size, hidden1, hidden2, output_size)
    ref = _reference(x, params)

    # f32 weights: exact check against the pure-JAX reference (padded-output path, B<=256).
    padded_f32 = pad_params(params, dtype=jnp.float32)
    out_f32 = jax.block_until_ready(self_driving_network(x, padded_f32))
    assert out_f32.shape == (batch, output_size)
    assert jnp.allclose(out_f32, ref, atol=1e-5, rtol=1e-5)

    # Default bf16 weights (bf16 MXU, f32 accumulation): loose sanity check.
    padded = pad_params(params)  # bf16 by default now
    out_bf16 = jax.block_until_ready(self_driving_network(x, padded))
    assert out_bf16.shape == (batch, output_size)
    assert jnp.allclose(out_bf16, ref, atol=1e-1, rtol=1e-1)

    # Larger batch: exercises the >=2-step grid (both TCs on v7x), bf16 x input,
    # the narrow (un-padded) output store, and a partial last batch tile.
    B_large = 300
    x_l = jax.random.normal(kxl, (B_large, input_size), jnp.float32)
    ref_l = _reference(x_l, params)
    out_l = jax.block_until_ready(self_driving_network(x_l.astype(jnp.bfloat16), padded))
    assert out_l.shape == (B_large, output_size)
    assert jnp.allclose(out_l, ref_l, atol=1e-1, rtol=1e-1)

    print("KERNEL_OK")
</pallas_src>

<mosaic_0001>
module attributes {stable_mosaic.version = 11 : i64} {
  func.func @kernel(%arg0: i32, %arg1: memref<8x16xf32, #tpu.memory_space<vmem>>, %arg2: memref<16x128xf32, #tpu.memory_space<vmem>>, %arg3: memref<128x128xf32, #tpu.memory_space<vmem>>, %arg4: memref<128x128xf32, #tpu.memory_space<vmem>>, %arg5: memref<1x384xf32, #tpu.memory_space<vmem>>, %arg6: memref<8x128xf32, #tpu.memory_space<vmem>>) attributes {dimension_semantics = [#tpu.dimension_semantics<parallel>], iteration_bounds = array<i64: 1>, scalar_prefetch = 0 : i64, scratch_operands = 0 : i64, tpu.core_type = #tpu.core_type<tc>, window_params = [{transform_indices = @transform_0, window_bounds = array<i64: 8, 16>}, {pipeline_mode = #tpu.pipeline_mode<synchronous>, transform_indices = @transform_1, window_bounds = array<i64: 16, 128>}, {pipeline_mode = #tpu.pipeline_mode<synchronous>, transform_indices = @transform_2, window_bounds = array<i64: 128, 128>}, {pipeline_mode = #tpu.pipeline_mode<synchronous>, transform_indices = @transform_3, window_bounds = array<i64: 128, 128>}, {pipeline_mode = #tpu.pipeline_mode<synchronous>, transform_indices = @transform_4, window_bounds = array<i64: 1, 384>}, {transform_indices = @transform_5, window_bounds = array<i64: 8, 128>}]} {
    %c0 = arith.constant 0 : index
    %c0_0 = arith.constant 0 : index
    %0 = vector.load %arg1[%c0, %c0_0] : memref<8x16xf32, #tpu.memory_space<vmem>>, vector<8x16xf32>
    %c0_1 = arith.constant 0 : index
    %c0_2 = arith.constant 0 : index
    %1 = vector.load %arg5[%c0_1, %c0_2] : memref<1x384xf32, #tpu.memory_space<vmem>>, vector<1x128xf32>
    %c0_3 = arith.constant 0 : index
    %c128 = arith.constant 128 : index
    %2 = vector.load %arg5[%c0_3, %c128] : memref<1x384xf32, #tpu.memory_space<vmem>>, vector<1x128xf32>
    %c0_4 = arith.constant 0 : index
    %c256 = arith.constant 256 : index
    %3 = vector.load %arg5[%c0_4, %c256] : memref<1x384xf32, #tpu.memory_space<vmem>>, vector<1x128xf32>
    %c0_5 = arith.constant 0 : index
    %c0_6 = arith.constant 0 : index
    %4 = vector.load %arg2[%c0_5, %c0_6] : memref<16x128xf32, #tpu.memory_space<vmem>>, vector<16x128xf32>
    %cst = arith.constant dense<0.000000e+00> : vector<8x128xf32>
    %5 = tpu.matmul %0, %4, %cst {dimension_numbers = #tpu.dot_dimension_numbers<[1], [0], [0], [1], [0, 0, 1, 1], [], []>} : vector<8x16xf32>, vector<16x128xf32>, vector<8x128xf32> -> vector<8x128xf32>
    %6 = vector.broadcast %1 : vector<1x128xf32> to vector<8x128xf32>
    %7 = arith.addf %5, %6 : vector<8x128xf32>
    %cst_7 = arith.constant 0.000000e+00 : f32
    %8 = vector.broadcast %cst_7 : f32 to vector<8x128xf32>
    %9 = arith.maximumf %7, %8 : vector<8x128xf32>
    %c0_8 = arith.constant 0 : index
    %c0_9 = arith.constant 0 : index
    %10 = vector.load %arg3[%c0_8, %c0_9] : memref<128x128xf32, #tpu.memory_space<vmem>>, vector<128x128xf32>
    %cst_10 = arith.constant dense<0.000000e+00> : vector<8x128xf32>
    %11 = tpu.matmul %9, %10, %cst_10 {dimension_numbers = #tpu.dot_dimension_numbers<[1], [0], [0], [1], [0, 0, 1, 1], [], []>} : vector<8x128xf32>, vector<128x128xf32>, vector<8x128xf32> -> vector<8x128xf32>
    %12 = vector.broadcast %2 : vector<1x128xf32> to vector<8x128xf32>
    %13 = arith.addf %11, %12 : vector<8x128xf32>
    %cst_11 = arith.constant 0.000000e+00 : f32
    %14 = vector.broadcast %cst_11 : f32 to vector<8x128xf32>
    %15 = arith.maximumf %13, %14 : vector<8x128xf32>
    %c0_12 = arith.constant 0 : index
    %c0_13 = arith.constant 0 : index
    %16 = vector.load %arg4[%c0_12, %c0_13] : memref<128x128xf32, #tpu.memory_space<vmem>>, vector<128x128xf32>
    %cst_14 = arith.constant dense<0.000000e+00> : vector<8x128xf32>
    %17 = tpu.matmul %15, %16, %cst_14 {dimension_numbers = #tpu.dot_dimension_numbers<[1], [0], [0], [1], [0, 0, 1, 1], [], []>} : vector<8x128xf32>, vector<128x128xf32>, vector<8x128xf32> -> vector<8x128xf32>
    %18 = vector.broadcast %3 : vector<1x128xf32> to vector<8x128xf32>
    %19 = arith.addf %17, %18 : vector<8x128xf32>
    %c0_15 = arith.constant 0 : index
    %c0_16 = arith.constant 0 : index
    %20 = vector.load %arg6[%c0_15, %c0_16] : memref<8x128xf32, #tpu.memory_space<vmem>>, vector<8x128xf32>
    tpu.vector_store %arg6[%c0_15, %c0_16], %19 {strides = array<i32>} : memref<8x128xf32, #tpu.memory_space<vmem>>, vector<8x128xf32>,
    return
  }
  func.func @transform_0(%arg0: i32) -> (i32, i32) {
    %c0_i32 = arith.constant 0 : i32
    %c0_i32_0 = arith.constant 0 : i32
    return %arg0, %c0_i32 : i32, i32
  }
  func.func @transform_1(%arg0: i32) -> (i32, i32) {
    %c0_i32 = arith.constant 0 : i32
    %c0_i32_0 = arith.constant 0 : i32
    %c0_i32_1 = arith.constant 0 : i32
    return %c0_i32, %c0_i32_0 : i32, i32
  }
  func.func @transform_2(%arg0: i32) -> (i32, i32) {
    %c0_i32 = arith.constant 0 : i32
    %c0_i32_0 = arith.constant 0 : i32
    %c0_i32_1 = arith.constant 0 : i32
    return %c0_i32, %c0_i32_0 : i32, i32
  }
  func.func @transform_3(%arg0: i32) -> (i32, i32) {
    %c0_i32 = arith.constant 0 : i32
    %c0_i32_0 = arith.constant 0 : i32
    %c0_i32_1 = arith.constant 0 : i32
    return %c0_i32, %c0_i32_0 : i32, i32
  }
  func.func @transform_4(%arg0: i32) -> (i32, i32) {
    %c0_i32 = arith.constant 0 : i32
    %c0_i32_0 = arith.constant 0 : i32
    %c0_i32_1 = arith.constant 0 : i32
    return %c0_i32, %c0_i32_0 : i32, i32
  }
  func.func @transform_5(%arg0: i32) -> (i32, i32) {
    %c0_i32 = arith.constant 0 : i32
    %c0_i32_0 = arith.constant 0 : i32
    return %arg0, %c0_i32 : i32, i32
  }
}

</mosaic_0001>

<bundles_post_ra>
// kernel: tpu_custom_call.1
= control target key start
LH: loop header
LB: loop body
LE: loop exit
PB: predicated region body
PF: predicated region fallthrough
CT: control target
= control target key end

     0   :  { %10 = vsyncpa [#allocation3], 0  ;;  %s799_s0 = inlined_call_operand.hbm [shape: f32[8,16], index: 0, kind: input, shape index: {}]   ;;  %s800_s1 = inlined_call_operand.hbm [shape: f32[16,128], index: 1, kind: input, shape index: {}]   ;;  %s801_s2 = inlined_call_operand.hbm [shape: f32[128,128], index: 2, kind: input, shape index: {}]   ;;  %s802_s3 = inlined_call_operand.hbm [shape: f32[128,128], index: 3, kind: input, shape index: {}]   ;;  %s803_s4 = inlined_call_operand.vmem [shape: f32[1,384], index: 4, kind: input, shape index: {}]   ;;  %s804_s5 = inlined_call_operand.hbm [shape: f32[8,128], index: 5, kind: output, shape index: {}]  }
   0x1   :  { %11 = vsyncpa [#allocation6], 0 }
   0x2   :  { %12 = vsyncpa [#allocation9], 0 }
   0x3   :  { %13 = vsyncpa [#allocation4], 0  ;;  %s661_s18 = smov [#allocation5]   ;;  %s543_s22 = scalar_lea.hbm %s800_s1, 256 }
   0x4   :  { %s29_s19 = sshll.u32 %s661_s18, 4  ;;  %p544_p0 = scmp.ne.s32.totalorder %s800_s1, %s543_s22  ;;  %s30_s19 = int_to_ptr.vmem [resolvable:$true] %s29_s19 }
   0x5   :  { %p547_p1 = scmp.lt.u32.totalorder %s543_s22, %s800_s1 }
   0x7   :  { %p549_p2 = pnand %p547_p1, %p544_p0 }
   0x9   :  { %552 = shalt.err (!%p549_p2)
}
   0xa   :  { %s553_s27 = scalar_lea.vmem %s30_s19, 256  ;;  %p558_p4 = scmp.lt.s32.totalorder %s30_s19, %s30_s19 }
   0xb   :  { %p554_p3 = scmp.ne.s32.totalorder %s30_s19, %s553_s27  ;;  %p559_p5 = scmp.lt.s32.totalorder %s553_s27, %s553_s27 }
   0xd   :  { %p560_p6 = por %p559_p5, %p558_p4 }
   0xf   :  { %p561_p7 = pnand %p560_p6, %p554_p3 }
  0x11   :  { %564 = shalt.err (!%p561_p7)
}
  0x12   :  { %s662_s28 = smov 128   ;;  %s663_s29 = smov 8  }
  0x13   :  { %35 = dma.hbm_to_vmem [thread:$0]  %s800_s1, 256, %s30_s19, [#allocation6], %s662_s28, %s662_s28, %s663_s29  }
  0x14   :  { %s664_s7 = smov [#allocation2]   ;;  %s665_s9 = smov [#allocation7]  }
  0x15   :  { %s20_s8 = sshll.u32 %s664_s7, 4  ;;  %s41_s10 = sshll.u32 %s665_s9, 4  ;;  %s21_s8 = int_to_ptr.vmem [resolvable:$true] %s20_s8  ;;  %s42_s10 = int_to_ptr.vmem [resolvable:$true] %s41_s10 }
  0x16   :  { %s565_s13 = scalar_lea.hbm %s799_s0, 128 }
  0x17   :  { %p566_p8 = scmp.ne.s32.totalorder %s799_s0, %s565_s13  ;;  %p569_p9 = scmp.lt.u32.totalorder %s565_s13, %s799_s0 }
  0x19   :  { %p571_p10 = pnand %p569_p9, %p566_p8 }
  0x1b   :  { %574 = shalt.err (!%p571_p10)
}
  0x1c   :  { %s575_s1 = scalar_lea.vmem %s21_s8, 128  ;;  %p580_p12 = scmp.lt.s32.totalorder %s21_s8, %s21_s8 }
  0x1d   :  { %p576_p11 = scmp.ne.s32.totalorder %s21_s8, %s575_s1  ;;  %p581_p13 = scmp.lt.s32.totalorder %s575_s1, %s575_s1 }
  0x1f   :  { %p582_p0 = por %p581_p13, %p580_p12 }
  0x21   :  { %p583_p1 = pnand %p582_p0, %p576_p11 }
  0x23   :  { %586 = shalt.err (!%p583_p1)
}
  0x24   :  { %23 = dma.hbm_to_vmem [thread:$0]  %s799_s0, 128, %s21_s8, [#allocation3]  }
  0x25   :  { %s587_s22 = scalar_lea.hbm %s801_s2, 2048 }
  0x26   :  { %p588_p2 = scmp.ne.s32.totalorder %s801_s2, %s587_s22  ;;  %p591_p3 = scmp.lt.u32.totalorder %s587_s22, %s801_s2 }
  0x28   :  { %p593_p4 = pnand %p591_p3, %p588_p2 }
  0x2a   :  { %596 = shalt.err (!%p593_p4)
}
  0x2b   :  { %s597_s27 = scalar_lea.vmem %s42_s10, 2048  ;;  %p602_p6 = scmp.lt.s32.totalorder %s42_s10, %s42_s10 }
  0x2c   :  { %p598_p5 = scmp.ne.s32.totalorder %s42_s10, %s597_s27  ;;  %p603_p7 = scmp.lt.s32.totalorder %s597_s27, %s597_s27 }
  0x2e   :  { %p604_p8 = por %p603_p7, %p602_p6 }
  0x30   :  { %p605_p9 = pnand %p604_p8, %p598_p5 }
  0x32   :  { %608 = shalt.err (!%p605_p9)
}
  0x33   :  { %47 = dma.hbm_to_vmem [thread:$0]  %s801_s2, 2048, %s42_s10, [#allocation6], %s662_s28, %s662_s28, %s663_s29  }
  0x34   :  { %s666_s6 = smov [#allocation8]   ;;  %s609_s11 = scalar_lea.hbm %s802_s3, 2048 }
  0x35   :  { %s53_s7 = sshll.u32 %s666_s6, 4  ;;  %p610_p10 = scmp.ne.s32.totalorder %s802_s3, %s609_s11  ;;  %s54_s7 = int_to_ptr.vmem [resolvable:$true] %s53_s7 }
  0x36   :  { %p613_p11 = scmp.lt.u32.totalorder %s609_s11, %s802_s3 }
  0x38   :  { %p615_p12 = pnand %p613_p11, %p610_p10 }
  0x3a   :  { %618 = shalt.err (!%p615_p12)
}
  0x3b   :  { %s619_s16 = scalar_lea.vmem %s54_s7, 2048  ;;  %p624_p0 = scmp.lt.s32.totalorder %s54_s7, %s54_s7 }
  0x3c   :  { %p620_p13 = scmp.ne.s32.totalorder %s54_s7, %s619_s16  ;;  %p625_p1 = scmp.lt.s32.totalorder %s619_s16, %s619_s16 }
  0x3e   :  { %p626_p2 = por %p625_p1, %p624_p0 }
  0x40   :  { %p627_p3 = pnand %p626_p2, %p620_p13 }
  0x42   :  { %630 = shalt.err (!%p627_p3)
}
  0x43   :  { %59 = dma.hbm_to_vmem [thread:$0]  %s802_s3, 2048, %s54_s7, [#allocation9], %s662_s28, %s662_s28, %s663_s29  }
  0x44   :  { %653 = dma.done.wait [#allocation3], 128  }
  0x45   :  { %654 = vsyncadd [#allocation3], 4294967168 }
  0x46   :  { %655 = dma.done.wait [#allocation6], 2304  }
  0x47   :  { %656 = vsyncadd [#allocation6], 4294964992 }
  0x48   :  { %657 = dma.done.wait [#allocation9], 2048  }
  0x49   :  { %658 = vsyncadd [#allocation9], 4294965248  ;;  %v667_v0 = vmov 0.0|0.0   ;;  %vm668_vm0 = vmmov 0   ;;  %v669_v1 = vmov 0.0   ;;  %v78_v2 = vld [vmem:[#allocation5] sm:$0xff] }
  0x4a   :  { %482 = vmatprep.subr.bf16.mxu0 %v667_v0  ;;  %409 = vmatprep.mubr.msk.f32.mxu0 %vm668_vm0, %v669_v1  ;;  %v79_v3 = vld [vmem:[#allocation5 + $0x8] sm:$0xff]  ;;  %v161_v5 = vld [vmem:[#allocation7] sm:$0xff]  ;;  %v162_v6 = vld [vmem:[#allocation7 + $0x8] sm:$0xff]  ;;  %vm86_vm1 = vcmask 130048   ;;  %s670_s19 = smov [#allocation10]  }
  0x4b   :  { %485 = vmatprep.subr.bf16.mxu1 %v667_v0  ;;  %444 = vmatprep.mubr.msk.f32.mxu1 %vm668_vm0, %v669_v1  ;;  %v483_v4 = vpack.c.bf16 %v79_v3, %v78_v2  ;;  %v163_v7 = vld [vmem:[#allocation7 + $0x10] sm:$0xff]  ;;  %v486_v8 = vpack.c.bf16 %v162_v6, %v161_v5  ;;  %v164_v9 = vld [vmem:[#allocation7 + $0x18] sm:$0xff]  ;;  %v74_v10 = vld [vmem:[#allocation2] sm:$0xff]  ;;  %s353_s20 = sshll.u32 %s670_s19, 4  ;;  %s354_s20 = int_to_ptr.vmem [resolvable:$true] %s353_s20 }
  0x4c   :  { %v489_v11 = vpack.c.bf16 %v164_v9, %v163_v7  ;;  %v165_v12 = vld [vmem:[#allocation7 + $0x20] sm:$0xff]  ;;  %v166_v13 = vld [vmem:[#allocation7 + $0x28] sm:$0xff]  ;;  %v167_v15 = vld [vmem:[#allocation7 + $0x30] sm:$0xff]  ;;  %s631_s21 = scalar_lea.vmem %s354_s20, 128  ;;  %p636_p5 = scmp.lt.s32.totalorder %s354_s20, %s354_s20 }
  0x4d   :  { %484 = vmatpush3.bf16.msra.mxu0 %v483_v4  ;;  %487 = vmatpush3.bf16.msra.mxu1 %v486_v8  ;;  %v492_v14 = vpack.c.bf16 %v166_v13, %v165_v12  ;;  %v168_v16 = vld [vmem:[#allocation7 + $0x38] sm:$0xff]  ;;  %v169_v18 = vld [vmem:[#allocation7 + $0x40] sm:$0xff]  ;;  %v170_v19 = vld [vmem:[#allocation7 + $0x48] sm:$0xff]  ;;  %p632_p4 = scmp.ne.s32.totalorder %s354_s20, %s631_s21  ;;  %p637_p6 = scmp.lt.s32.totalorder %s631_s21, %s631_s21 }
  0x4e   :  { %509 = vmatprep.subr.bf16.mxu0 %v667_v0  ;;  %488 = vmatprep.subr.bf16.mxu1 %v667_v0  ;;  %v495_v17 = vpack.c.bf16 %v168_v16, %v167_v15  ;;  %v498_v20 = vpack.c.bf16 %v170_v19, %v169_v18  ;;  %v171_v21 = vld [vmem:[#allocation7 + $0x50] sm:$0xff]  ;;  %v172_v22 = vld [vmem:[#allocation7 + $0x58] sm:$0xff]  ;;  %v173_v24 = vld [vmem:[#allocation7 + $0x60] sm:$0xff] }
  0x4f   :  { %v501_v23 = vpack.c.bf16 %v172_v22, %v171_v21  ;;  %v174_v25 = vld [vmem:[#allocation7 + $0x68] sm:$0xff]  ;;  %v175_v27 = vld [vmem:[#allocation7 + $0x70] sm:$0xff]  ;;  %v176_v28 = vld [vmem:[#allocation7 + $0x78] sm:$0xff]  ;;  %p638_p7 = por %p637_p6, %p636_p5 }
  0x50   :  { %410 = vmatmul.mubr.msk.f32.vlgmr.msra.gmra.mrb[0].mxu0 %vm86_vm1, %v74_v10  ;;  %v504_v26 = vpack.c.bf16 %v174_v25, %v173_v24  ;;  %v507_v29 = vpack.c.bf16 %v176_v28, %v175_v27  ;;  %v254_v30 = vld [vmem:[#allocation8] sm:$0xff]  ;;  %v255_v31 = vld [vmem:[#allocation8 + $0x8] sm:$0xff]  ;;  %v256_v32 = vld [vmem:[#allocation8 + $0x10] sm:$0xff] }
  0x51   :  { %479 = vmatprep.mubr.msk.f32.mxu0 %vm668_vm0, %v669_v1  ;;  %490 = vmatpush3.bf16.msra.mxu1 %v489_v11  ;;  %v510_v33 = vpack.c.bf16 %v255_v31, %v254_v30  ;;  %v257_v34 = vld [vmem:[#allocation8 + $0x18] sm:$0xff]  ;;  %v258_v36 = vld [vmem:[#allocation8 + $0x20] sm:$0xff]  ;;  %v259_v37 = vld [vmem:[#allocation8 + $0x28] sm:$0xff]  ;;  %p639_p8 = pnand %p638_p7, %p632_p4 }
  0x52   :  { %491 = vmatprep.subr.bf16.mxu1 %v667_v0  ;;  %v513_v35 = vpack.c.bf16 %v257_v34, %v256_v32  ;;  %v516_v38 = vpack.c.bf16 %v259_v37, %v258_v36  ;;  %v260_v39 = vld [vmem:[#allocation8 + $0x30] sm:$0xff]  ;;  %v261_v40 = vld [vmem:[#allocation8 + $0x38] sm:$0xff]  ;;  %v262_v42 = vld [vmem:[#allocation8 + $0x40] sm:$0xff] }
  0x53   :  { %511 = vmatpush3.bf16.msra.mxu0 %v510_v33  ;;  %v519_v41 = vpack.c.bf16 %v261_v40, %v260_v39  ;;  %v263_v43 = vld [vmem:[#allocation8 + $0x48] sm:$0xff]  ;;  %v264_v45 = vld [vmem:[#allocation8 + $0x50] sm:$0xff]  ;;  %v265_v46 = vld [vmem:[#allocation8 + $0x58] sm:$0xff] }
  0x54   :  { %512 = vmatprep.subr.bf16.mxu0 %v667_v0  ;;  %v522_v44 = vpack.c.bf16 %v263_v43, %v262_v42  ;;  %v525_v47 = vpack.c.bf16 %v265_v46, %v264_v45  ;;  %v266_v48 = vld [vmem:[#allocation8 + $0x60] sm:$0xff]  ;;  %v267_v49 = vld [vmem:[#allocation8 + $0x68] sm:$0xff]  ;;  %v268_v56 = vld [vmem:[#allocation8 + $0x70] sm:$0xff] }
  0x55   :  { %493 = vmatpush3.bf16.msra.mxu1 %v492_v14  ;;  %v528_v50 = vpack.c.bf16 %v267_v49, %v266_v48  ;;  %v364_v51 = vld [vmem:[%s803_s4] ss:$0 sm:$0xff]  ;;  %v269_v57 = vld [vmem:[#allocation8 + $0x78] sm:$0xff]  ;;  %v366_v59 = vld [vmem:[%s803_s4 + $0x1] ss:$0 sm:$0xff] }
  0x56   :  { %494 = vmatprep.subr.bf16.mxu1 %v667_v0  ;;  %v531_v58 = vpack.c.bf16 %v269_v57, %v268_v56 }
  0x57   :  { %514 = vmatpush3.bf16.msra.mxu0 %v513_v35 }
  0x58   :  { %515 = vmatprep.subr.bf16.mxu0 %v667_v0 }
  0x59   :  { %496 = vmatpush3.bf16.msra.mxu1 %v495_v17 }
  0x5a   :  { %497 = vmatprep.subr.bf16.mxu1 %v667_v0 }
  0x5b   :  { %517 = vmatpush3.bf16.msra.mxu0 %v516_v38 }
  0x5c   :  { %518 = vmatprep.subr.bf16.mxu0 %v667_v0 }
  0x5d   :  { %499 = vmatpush3.bf16.msra.mxu1 %v498_v20 }
  0x5e   :  { %500 = vmatprep.subr.bf16.mxu1 %v667_v0 }
  0x5f   :  { %520 = vmatpush3.bf16.msra.mxu0 %v519_v41 }
  0x60   :  { %521 = vmatprep.subr.bf16.mxu0 %v667_v0 }
  0x61   :  { %502 = vmatpush3.bf16.msra.mxu1 %v501_v23 }
  0x62   :  { %503 = vmatprep.subr.bf16.mxu1 %v667_v0 }
  0x63   :  { %523 = vmatpush3.bf16.msra.mxu0 %v522_v44 }
  0x64   :  { %524 = vmatprep.subr.bf16.mxu0 %v667_v0 }
  0x65   :  { %505 = vmatpush3.bf16.msra.mxu1 %v504_v26 }
  0x66   :  { %506 = vmatprep.subr.bf16.mxu1 %v667_v0 }
  0x67   :  { %526 = vmatpush3.bf16.msra.mxu0 %v525_v47 }
  0x68   :  { %527 = vmatprep.subr.bf16.mxu0 %v667_v0 }
  0x69   :  { %508 = vmatpush3.bf16.msra.mxu1 %v507_v29 }
  0x6b   :  { %529 = vmatpush3.bf16.msra.mxu0 %v528_v50 }
  0x6c   :  { %530 = vmatprep.subr.bf16.mxu0 %v667_v0  ;;  %v367_v0 = vld [vmem:[%s803_s4 + $0x2] ss:$0 sm:$0xff] }
  0x6f   :  { %532 = vmatpush3.bf16.msra.mxu0 %v531_v58 }
 0x123   :  { %v156_v52 = vpop.f32.mrb[0].mxu0 }
 0x124   :  { %v157_v53 = vadd.f32 %v364_v51, %v156_v52  ;;  %v411_v54 = vpop.f32.mrb[1].mxu0 }
 0x126   :  { %v160_v55 = vmax.f32 %v157_v53, 0.0 }
 0x128   :  { %445 = vmatmul.mubr.f32.vlgmr.msra.gmra.mrb[0].mxu1 %v160_v55 }
 0x1fb   :  { %v249_v60 = vpop.f32.mrb[0].mxu1 }
 0x1fc   :  { %v250_v61 = vadd.f32 %v366_v59, %v249_v60  ;;  %v446_v62 = vpop.f32.mrb[1].mxu1 }
 0x1fe   :  { %v253_v63 = vmax.f32 %v250_v61, 0.0 }
 0x200   :  { %480 = vmatmul.mubr.f32.vlgmr.msra.gmra.mrb[2].mxu0 %v253_v63 }
 0x2d3   :  { %v342_v1 = vpop.f32.mrb[2].mxu0 }
 0x2d4   :  { %v343_v2 = vadd.f32 %v367_v0, %v342_v1  ;;  %v481_v3 = vpop.f32.mrb[3].mxu0 }
 0x2d6   :  { %346 = vst [vmem:[#allocation10] sm:$0xff] %v343_v2 }
 0x2d7   :  { %642 = shalt.err (!%p639_p8)
}
 0x2d8   :  { %s643_s24 = scalar_lea.hbm %s804_s5, 128 }
 0x2d9   :  { %p644_p9 = scmp.ne.s32.totalorder %s804_s5, %s643_s24  ;;  %p647_p10 = scmp.lt.u32.totalorder %s643_s24, %s804_s5 }
 0x2db   :  { %p649_p11 = pnand %p647_p10, %p644_p9 }
 0x2dd   :  { %652 = shalt.err (!%p649_p11)
}
 0x2de   :  { %356 = dma.vmem_to_hbm [thread:$0]  %s354_s20, 128, %s804_s5, [#allocation4]  }
 0x2df   :  { %659 = dma.done.wait [#allocation4], 128  }
 0x2e0   :  { %660 = vsyncadd [#allocation4], 4294967168 }
 0x2e1   :  { %360 = vsyncpa [#allocation3], 1 }
 0x2e2   :  { %361 = vsyncpa [#allocation6], 1 }
 0x2e3   :  { %362 = vsyncpa [#allocation9], 1 }
 0x2e4   :  { %363 = vsyncpa [#allocation4], 1 }

</bundles_post_ra>
